<compile_context>
chip_gen: v7x
topology: tpu7x:2x2x1
jax: 0.10.0
libtpu: 0.0.40
codegen_flags: <defaults>
</compile_context>

<pallas_src>
import jax
import jax.numpy as jnp
from jax.experimental import pallas as pl
from jax.experimental.pallas import tpu as pltpu


def _make_attention_kernel(tanh_bf16: bool):
    def attention_kernel(h_ref, e_ref, wh_ref, we_ref, bv_ref, o_ref):
        # h_ref : (TB, Ddec)     hidden rows for this batch tile
        # e_ref : (S, TB, 2E)    encoder outputs, native seq-major layout
        # wh_ref: (Ddec, Ddec)   Wh^T (hidden part of attn_fc weight), resident
        # we_ref: (2E, Ddec)     We^T (encoder part of attn_fc weight), resident
        # bv_ref: (2, Ddec)      row 0 = attn_fc bias, row 1 = v_fc weight
        # o_ref : (TB, S)        softmax over S (lane axis)
        s, tb, e2 = e_ref.shape
        ddec = wh_ref.shape[0]

        bias = bv_ref[0:1, :]                                    # (1, Ddec)
        v_row = bv_ref[1:2, :]                                   # (1, Ddec)

        # Batched hidden projection: one small MXU matmul per grid step.
        hw = jnp.dot(h_ref[...], wh_ref[...],
                     preferred_element_type=jnp.float32) + bias  # (TB, Ddec)

        # Encoder projection: single MXU matmul over all S*TB rows of the tile.
        # The reshape merges the leading S dim with the sublane (TB) dim and is
        # layout-preserving because the wrapper guarantees TB % 8 == 0.
        ew = jnp.dot(e_ref[...].reshape(s * tb, e2), we_ref[...],
                     preferred_element_type=jnp.float32)
        ew = ew.reshape(s, tb, ddec)                             # (S, TB, Ddec)

        pre = ew + hw[None, :, :]                                # (S, TB, Ddec)
        if tanh_bf16:
            # bf16 EUP path: ~2x transcendental throughput on v6e/v7x only
            # (v5e has no bf16 EUP/VPU path -- keep False there).
            energy = jnp.tanh(pre.astype(jnp.bfloat16)).astype(jnp.float32)
        else:
            energy = jnp.tanh(pre)

        # v-projection: VPU multiply + XLU lane reduction (avoids an N=1 matmul).
        score = jnp.sum(energy * v_row[None, :, :], axis=-1)     # (S, TB)

        # Small XLU transpose so the softmax reductions run along the lane axis
        # and the output block is (TB, S) with S equal to the full output dim.
        score_t = score.T                                        # (TB, S)
        m = jnp.max(score_t, axis=-1, keepdims=True)             # (TB, 1)
        p = jnp.exp(score_t - m)                                 # (TB, S)
        denom = jnp.sum(p, axis=-1, keepdims=True)               # (TB, 1)
        # approx reciprocal (EUP): rows sum to 1 within ~1e-3; switch to
        # approx=False if downstream code needs exact normalization.
        o_ref[...] = (p * pl.reciprocal(denom, approx=True)).astype(o_ref.dtype)

    return attention_kernel


def _round_up(x, m):
    return (x + m - 1) // m * m


def _vmem_capacity_bytes(default=128 << 20):
    try:
        return int(getattr(pltpu.get_tpu_info(), "vmem_capacity_bytes", default))
    except Exception:
        return default


def _pick_batch_tile(batch, seq, e2, ddec, itemsize, budget_bytes):
    """Largest batch tile (multiple of 8) whose per-step VMEM stays in budget."""
    # Per batch row per grid step:
    #   * double-buffered encoder stream (the dominant HBM traffic)
    #   * f32 ew + energy intermediates (dominate when Ddec >= 2E)
    #   * double-buffered hidden + output blocks
    per_row = (seq * (2 * e2 * itemsize + 2 * ddec * 4)
               + 2 * ddec * itemsize + 2 * seq * itemsize)
    tb = budget_bytes // max(1, per_row)
    tb = max(8, (tb // 8) * 8)
    tb = min(tb, _round_up(batch, 8))
    # Keep at least two grid steps when the batch allows it so the "parallel"
    # axis can shard across v7x's two TensorCores (a single tiny tile is
    # exempt -- splitting it would be pure overhead).
    if batch >= 16:
        tb = min(tb, _round_up(pl.cdiv(batch, 2), 8))
    return max(8, (tb // 8) * 8)


def attention_forward(hidden, encoder_outputs, attn_w, attn_b, v_w,
                      *, batch_tile=None, tanh_bf16=False):
    """hidden: [B, Ddec]; encoder_outputs: [S, B, 2E] (PyTorch seq-major layout).

    Returns softmax attention weights of shape [B, S].
    """
    S, B, E2 = encoder_outputs.shape
    Ddec = hidden.shape[1]
    dtype = hidden.dtype
    itemsize = jnp.dtype(dtype).itemsize

    # The encoder tensor is streamed in its native (S, B, 2E) layout -- no
    # wrapper-side transpose/copy of the dominant HBM tensor.  Only when the
    # batch is smaller than one sublane tile (8) do we zero-pad it, so every
    # block keeps an 8-aligned sublane extent and the in-kernel reshape stays
    # layout-preserving.  Larger non-multiple-of-8 batches just get a partial
    # edge tile; its garbage rows flow through tanh/exp but only per-row
    # reductions touch them and they are never written back (benign).
    Bp = B if B >= 8 else 8
    if Bp != B:
        encoder_outputs = jnp.pad(encoder_outputs, ((0, 0), (0, Bp - B), (0, 0)))
        hidden = jnp.pad(hidden, ((0, Bp - B), (0, 0)))

    # Cheap parameter glue (tiny tensors): split the concat weight, pre-transpose,
    # and pack bias + v into one resident (2, Ddec) operand.
    wh_t = attn_w[:, :Ddec].T                                   # (Ddec, Ddec)
    we_t = attn_w[:, Ddec:].T                                   # (2E, Ddec)
    bv = jnp.concatenate([attn_b.reshape(1, Ddec), v_w.reshape(1, Ddec)], axis=0)

    # Per-generation VMEM sizing: 128 MiB (v5e/v6e) -> 64 MiB limit, ~10 MiB
    # tile budget; 64 MiB (v7x) -> 32 MiB limit, ~5 MiB tile budget.
    vmem_cap = _vmem_capacity_bytes()
    vmem_limit = min(64 << 20, max(32 << 20, vmem_cap // 2))
    if batch_tile is None:
        batch_tile = _pick_batch_tile(Bp, S, E2, Ddec, itemsize,
                                      budget_bytes=vmem_limit // 6)
    tb = batch_tile
    grid = (pl.cdiv(Bp, tb),)

    flops = 2 * B * S * E2 * Ddec + 2 * B * Ddec * Ddec + 2 * B * S * Ddec
    bytes_accessed = itemsize * (S * B * E2 + B * Ddec + Ddec * Ddec
                                 + E2 * Ddec + 2 * Ddec + B * S)
    cost = pl.CostEstimate(flops=flops,
                           transcendentals=B * S * (Ddec + 1),
                           bytes_accessed=bytes_accessed)

    out = pl.pallas_call(
        _make_attention_kernel(tanh_bf16),
        out_shape=jax.ShapeDtypeStruct((Bp, S), dtype),
        grid_spec=pltpu.PrefetchScalarGridSpec(
            num_scalar_prefetch=0,
            grid=grid,
            in_specs=[
                pl.BlockSpec((tb, Ddec), lambda i: (i, 0)),       # hidden tile
                pl.BlockSpec((S, tb, E2), lambda i: (0, i, 0)),   # encoder (native layout)
                pl.BlockSpec((Ddec, Ddec), lambda i: (0, 0)),     # Wh^T (resident)
                pl.BlockSpec((E2, Ddec), lambda i: (0, 0)),       # We^T (resident)
                pl.BlockSpec((2, Ddec), lambda i: (0, 0)),        # [bias; v] (resident)
            ],
            out_specs=pl.BlockSpec((tb, S), lambda i: (i, 0)),    # (B, S) scores
        ),
        compiler_params=pltpu.CompilerParams(
            dimension_semantics=("parallel",),
            vmem_limit_bytes=vmem_limit,
        ),
        cost_estimate=cost,
    )(hidden, encoder_outputs, wh_t, we_t, bv)
    return out[:B]                                               # [B, S]


def attention_ref(hidden, encoder_outputs, attn_w, attn_b, v_w):
    """Pure-JAX reference mirroring the PyTorch forward."""
    S, B, _ = encoder_outputs.shape
    h = jnp.repeat(hidden[:, None, :], S, axis=1)              # [B, S, Ddec]
    e = jnp.transpose(encoder_outputs, (1, 0, 2))              # [B, S, 2E]
    cat = jnp.concatenate([h, e], axis=2)                      # [B, S, Ddec+2E]
    energy = jnp.tanh(cat @ attn_w.T + attn_b)                 # [B, S, Ddec]
    attention = (energy @ v_w.T)[:, :, 0]                      # [B, S]
    return jax.nn.softmax(attention, axis=1)


if __name__ == "__main__":
    # Small shapes consistent with the module's forward.
    encoder_hidden_dim = 16
    decoder_hidden_dim = 32
    B, S = 2, 8
    E2 = encoder_hidden_dim * 2

    key = jax.random.PRNGKey(0)
    k1, k2, k3, k4, k5 = jax.random.split(key, 5)

    # Deterministic parameter init (shapes from the nn.Linear definitions;
    # cat order in forward is (hidden, encoder_outputs)).
    attn_w = jax.random.normal(k1, (decoder_hidden_dim, decoder_hidden_dim + E2),
                               dtype=jnp.float32) * 0.1
    attn_b = jax.random.normal(k2, (decoder_hidden_dim,), dtype=jnp.float32) * 0.1
    v_w = jax.random.normal(k3, (1, decoder_hidden_dim), dtype=jnp.float32) * 0.1

    hidden = jax.random.normal(k4, (B, decoder_hidden_dim), dtype=jnp.float32)
    encoder_outputs = jax.random.normal(k5, (S, B, E2), dtype=jnp.float32)

    out = attention_forward(hidden, encoder_outputs, attn_w, attn_b, v_w)
    out = jax.block_until_ready(out)

    ref = attention_ref(hidden, encoder_outputs, attn_w, attn_b, v_w)
    assert out.shape == (B, S)
    # approx reciprocal in the softmax epilogue -> slightly relaxed tolerance
    assert jnp.allclose(out, ref, atol=5e-3, rtol=5e-3), "mismatch vs reference"
    assert jnp.allclose(jnp.sum(out, axis=1), 1.0, atol=5e-3), "rows not normalized"

    print("KERNEL_OK")
</pallas_src>

<mosaic_0001>
module attributes {stable_mosaic.version = 11 : i64} {
  func.func @attention_kernel(%arg0: i32, %arg1: memref<8x32xf32, #tpu.memory_space<vmem>>, %arg2: memref<8x8x32xf32, #tpu.memory_space<vmem>>, %arg3: memref<32x32xf32, #tpu.memory_space<vmem>>, %arg4: memref<32x32xf32, #tpu.memory_space<vmem>>, %arg5: memref<2x32xf32, #tpu.memory_space<vmem>>, %arg6: memref<8x8xf32, #tpu.memory_space<vmem>>) attributes {dimension_semantics = [#tpu.dimension_semantics<parallel>], iteration_bounds = array<i64: 1>, scalar_prefetch = 0 : i64, scratch_operands = 0 : i64, tpu.core_type = #tpu.core_type<tc>, window_params = [{transform_indices = @transform_0, window_bounds = array<i64: 8, 32>}, {transform_indices = @transform_1, window_bounds = array<i64: 8, 8, 32>}, {pipeline_mode = #tpu.pipeline_mode<synchronous>, transform_indices = @transform_2, window_bounds = array<i64: 32, 32>}, {pipeline_mode = #tpu.pipeline_mode<synchronous>, transform_indices = @transform_3, window_bounds = array<i64: 32, 32>}, {pipeline_mode = #tpu.pipeline_mode<synchronous>, transform_indices = @transform_4, window_bounds = array<i64: 2, 32>}, {transform_indices = @transform_5, window_bounds = array<i64: 8, 8>}]} {
    %c0 = arith.constant 0 : index
    %c0_0 = arith.constant 0 : index
    %0 = vector.load %arg5[%c0, %c0_0] : memref<2x32xf32, #tpu.memory_space<vmem>>, vector<1x32xf32>
    %c1 = arith.constant 1 : index
    %c0_1 = arith.constant 0 : index
    %1 = vector.load %arg5[%c1, %c0_1] : memref<2x32xf32, #tpu.memory_space<vmem>>, vector<1x32xf32>
    %c0_2 = arith.constant 0 : index
    %c0_3 = arith.constant 0 : index
    %2 = vector.load %arg1[%c0_2, %c0_3] : memref<8x32xf32, #tpu.memory_space<vmem>>, vector<8x32xf32>
    %c0_4 = arith.constant 0 : index
    %c0_5 = arith.constant 0 : index
    %3 = vector.load %arg3[%c0_4, %c0_5] : memref<32x32xf32, #tpu.memory_space<vmem>>, vector<32x32xf32>
    %cst = arith.constant dense<0.000000e+00> : vector<8x32xf32>
    %4 = tpu.matmul %2, %3, %cst {dimension_numbers = #tpu.dot_dimension_numbers<[1], [0], [0], [1], [0, 0, 1, 1], [], []>} : vector<8x32xf32>, vector<32x32xf32>, vector<8x32xf32> -> vector<8x32xf32>
    %5 = vector.broadcast %0 : vector<1x32xf32> to vector<8x32xf32>
    %6 = arith.addf %4, %5 : vector<8x32xf32>
    %c0_6 = arith.constant 0 : index
    %c0_7 = arith.constant 0 : index
    %c0_8 = arith.constant 0 : index
    %7 = vector.load %arg2[%c0_6, %c0_7, %c0_8] : memref<8x8x32xf32, #tpu.memory_space<vmem>>, vector<8x8x32xf32>
    %8 = vector.shape_cast %7 : vector<8x8x32xf32> to vector<64x32xf32>
    %c0_9 = arith.constant 0 : index
    %c0_10 = arith.constant 0 : index
    %9 = vector.load %arg4[%c0_9, %c0_10] : memref<32x32xf32, #tpu.memory_space<vmem>>, vector<32x32xf32>
    %cst_11 = arith.constant dense<0.000000e+00> : vector<64x32xf32>
    %10 = tpu.matmul %8, %9, %cst_11 {dimension_numbers = #tpu.dot_dimension_numbers<[1], [0], [0], [1], [0, 0, 1, 1], [], []>} : vector<64x32xf32>, vector<32x32xf32>, vector<64x32xf32> -> vector<64x32xf32>
    %11 = vector.shape_cast %10 : vector<64x32xf32> to vector<8x8x32xf32>
    %12 = vector.shape_cast %6 : vector<8x32xf32> to vector<1x8x32xf32>
    %13 = vector.broadcast %12 : vector<1x8x32xf32> to vector<8x8x32xf32>
    %14 = arith.addf %11, %13 : vector<8x8x32xf32>
    %15 = math.tanh %14 : vector<8x8x32xf32>
    %16 = vector.shape_cast %1 : vector<1x32xf32> to vector<1x1x32xf32>
    %17 = vector.broadcast %16 : vector<1x1x32xf32> to vector<8x8x32xf32>
    %18 = arith.mulf %15, %17 : vector<8x8x32xf32>
    %cst_12 = arith.constant dense<0.000000e+00> : vector<8x8xf32>
    %19 = vector.multi_reduction <add>, %18, %cst_12 [2] : vector<8x8x32xf32> to vector<8x8xf32>
    %20 = tpu.transpose %19, [1, 0] : vector<8x8xf32> -> vector<8x8xf32>
    %cst_13 = arith.constant dense<0xFF800000> : vector<8xf32>
    %21 = vector.multi_reduction <maximumf>, %20, %cst_13 [1] : vector<8x8xf32> to vector<8xf32>
    %22 = vector.shape_cast %21 : vector<8xf32> to vector<8x1xf32>
    %23 = vector.broadcast %22 : vector<8x1xf32> to vector<8x8xf32>
    %24 = arith.subf %20, %23 : vector<8x8xf32>
    %25 = math.exp %24 : vector<8x8xf32>
    %cst_14 = arith.constant dense<0.000000e+00> : vector<8xf32>
    %26 = vector.multi_reduction <add>, %25, %cst_14 [1] : vector<8x8xf32> to vector<8xf32>
    %27 = vector.shape_cast %26 : vector<8xf32> to vector<8x1xf32>
    %28 = tpu.reciprocal %27 {approx = true} : vector<8x1xf32> -> vector<8x1xf32>
    %29 = vector.broadcast %28 : vector<8x1xf32> to vector<8x8xf32>
    %30 = arith.mulf %25, %29 : vector<8x8xf32>
    %c0_15 = arith.constant 0 : index
    %c0_16 = arith.constant 0 : index
    %31 = vector.load %arg6[%c0_15, %c0_16] : memref<8x8xf32, #tpu.memory_space<vmem>>, vector<8x8xf32>
    tpu.vector_store %arg6[%c0_15, %c0_16], %30 {strides = array<i32>} : memref<8x8xf32, #tpu.memory_space<vmem>>, vector<8x8xf32>,
    return
  }
  func.func @transform_0(%arg0: i32) -> (i32, i32) {
    %c0_i32 = arith.constant 0 : i32
    %c0_i32_0 = arith.constant 0 : i32
    return %arg0, %c0_i32 : i32, i32
  }
  func.func @transform_1(%arg0: i32) -> (i32, i32, i32) {
    %c0_i32 = arith.constant 0 : i32
    %c0_i32_0 = arith.constant 0 : i32
    %c0_i32_1 = arith.constant 0 : i32
    return %c0_i32, %arg0, %c0_i32_0 : i32, i32, i32
  }
  func.func @transform_2(%arg0: i32) -> (i32, i32) {
    %c0_i32 = arith.constant 0 : i32
    %c0_i32_0 = arith.constant 0 : i32
    %c0_i32_1 = arith.constant 0 : i32
    return %c0_i32, %c0_i32_0 : i32, i32
  }
  func.func @transform_3(%arg0: i32) -> (i32, i32) {
    %c0_i32 = arith.constant 0 : i32
    %c0_i32_0 = arith.constant 0 : i32
    %c0_i32_1 = arith.constant 0 : i32
    return %c0_i32, %c0_i32_0 : i32, i32
  }
  func.func @transform_4(%arg0: i32) -> (i32, i32) {
    %c0_i32 = arith.constant 0 : i32
    %c0_i32_0 = arith.constant 0 : i32
    %c0_i32_1 = arith.constant 0 : i32
    return %c0_i32, %c0_i32_0 : i32, i32
  }
  func.func @transform_5(%arg0: i32) -> (i32, i32) {
    %c0_i32 = arith.constant 0 : i32
    %c0_i32_0 = arith.constant 0 : i32
    return %arg0, %c0_i32 : i32, i32
  }
}

</mosaic_0001>

<bundles_post_ra>
// kernel: tpu_custom_call.1
= control target key start
LH: loop header
LB: loop body
LE: loop exit
PB: predicated region body
PF: predicated region fallthrough
CT: control target
= control target key end

     0   :  { %10 = vsyncpa [#allocation3], 0  ;;  %s872_s0 = inlined_call_operand.hbm [shape: f32[8,32], index: 0, kind: input, shape index: {}]   ;;  %s873_s1 = inlined_call_operand.hbm [shape: f32[8,8,32], index: 1, kind: input, shape index: {}]   ;;  %s874_s2 = inlined_call_operand.hbm [shape: f32[32,32], index: 2, kind: input, shape index: {}]   ;;  %s875_s3 = inlined_call_operand.hbm [shape: f32[32,32], index: 3, kind: input, shape index: {}]   ;;  %s876_s4 = inlined_call_operand.hbm [shape: f32[2,32], index: 4, kind: input, shape index: {}]   ;;  %s877_s5 = inlined_call_operand.hbm [shape: f32[8,8], index: 5, kind: output, shape index: {}]  }
   0x1   :  { %11 = vsyncpa [#allocation6], 0 }
   0x2   :  { %12 = vsyncpa [#allocation9], 0 }
   0x3   :  { %13 = vsyncpa [#allocation4], 0  ;;  %s730_s18 = smov [#allocation5]   ;;  %s590_s22 = scalar_lea.hbm %s873_s1, 1024 }
   0x4   :  { %s29_s19 = sshll.u32 %s730_s18, 4  ;;  %p591_p0 = scmp.ne.s32.totalorder %s873_s1, %s590_s22  ;;  %s30_s19 = int_to_ptr.vmem [resolvable:$true] %s29_s19 }
   0x5   :  { %p594_p1 = scmp.lt.u32.totalorder %s590_s22, %s873_s1 }
   0x7   :  { %p596_p2 = pnand %p594_p1, %p591_p0 }
   0x9   :  { %599 = shalt.err (!%p596_p2)
}
   0xa   :  { %s600_s27 = scalar_lea.vmem %s30_s19, 1024  ;;  %p605_p4 = scmp.lt.s32.totalorder %s30_s19, %s30_s19 }
   0xb   :  { %p601_p3 = scmp.ne.s32.totalorder %s30_s19, %s600_s27  ;;  %p606_p5 = scmp.lt.s32.totalorder %s600_s27, %s600_s27 }
   0xd   :  { %p607_p6 = por %p606_p5, %p605_p4 }
   0xf   :  { %p608_p7 = pnand %p607_p6, %p601_p3 }
  0x11   :  { %611 = shalt.err (!%p608_p7)
}
  0x12   :  { %s731_s28 = smov 128   ;;  %s732_s29 = smov 8  }
  0x13   :  { %35 = dma.hbm_to_vmem [thread:$0]  %s873_s1, 1024, %s30_s19, [#allocation6], %s731_s28, %s731_s28, %s732_s29  }
  0x14   :  { %s733_s7 = smov [#allocation8]   ;;  %s734_s9 = smov [#allocation2]  }
  0x15   :  { %s53_s8 = sshll.u32 %s733_s7, 4  ;;  %s20_s10 = sshll.u32 %s734_s9, 4  ;;  %s54_s8 = int_to_ptr.vmem [resolvable:$true] %s53_s8  ;;  %s21_s10 = int_to_ptr.vmem [resolvable:$true] %s20_s10 }
  0x16   :  { %s612_s13 = scalar_lea.hbm %s875_s3, 512 }
  0x17   :  { %p613_p8 = scmp.ne.s32.totalorder %s875_s3, %s612_s13  ;;  %p616_p9 = scmp.lt.u32.totalorder %s612_s13, %s875_s3 }
  0x19   :  { %p618_p10 = pnand %p616_p9, %p613_p8 }
  0x1b   :  { %621 = shalt.err (!%p618_p10)
}
  0x1c   :  { %s622_s1 = scalar_lea.vmem %s54_s8, 512  ;;  %p627_p12 = scmp.lt.s32.totalorder %s54_s8, %s54_s8 }
  0x1d   :  { %p623_p11 = scmp.ne.s32.totalorder %s54_s8, %s622_s1  ;;  %p628_p13 = scmp.lt.s32.totalorder %s622_s1, %s622_s1 }
  0x1f   :  { %p629_p0 = por %p628_p13, %p627_p12 }
  0x21   :  { %p630_p1 = pnand %p629_p0, %p623_p11 }
  0x23   :  { %633 = shalt.err (!%p630_p1)
}
  0x24   :  { %59 = dma.hbm_to_vmem [thread:$0]  %s875_s3, 512, %s54_s8, [#allocation9], %s731_s28, %s731_s28, %s732_s29  }
  0x25   :  { %s634_s22 = scalar_lea.hbm %s872_s0, 128 }
  0x26   :  { %p635_p2 = scmp.ne.s32.totalorder %s872_s0, %s634_s22  ;;  %p638_p3 = scmp.lt.u32.totalorder %s634_s22, %s872_s0 }
  0x28   :  { %p640_p4 = pnand %p638_p3, %p635_p2 }
  0x2a   :  { %643 = shalt.err (!%p640_p4)
}
  0x2b   :  { %s644_s27 = scalar_lea.vmem %s21_s10, 128  ;;  %p649_p6 = scmp.lt.s32.totalorder %s21_s10, %s21_s10 }
  0x2c   :  { %p645_p5 = scmp.ne.s32.totalorder %s21_s10, %s644_s27  ;;  %p650_p7 = scmp.lt.s32.totalorder %s644_s27, %s644_s27 }
  0x2e   :  { %p651_p8 = por %p650_p7, %p649_p6 }
  0x30   :  { %p652_p9 = pnand %p651_p8, %p645_p5 }
  0x32   :  { %655 = shalt.err (!%p652_p9)
}
  0x33   :  { %23 = dma.hbm_to_vmem [thread:$0]  %s872_s0, 128, %s21_s10, [#allocation3]  }
  0x34   :  { %s735_s6 = smov [#allocation7]   ;;  %s736_s8 = smov [#allocation10]  }
  0x35   :  { %s41_s7 = sshll.u32 %s735_s6, 4  ;;  %s66_s9 = sshll.u32 %s736_s8, 4  ;;  %s42_s7 = int_to_ptr.vmem [resolvable:$true] %s41_s7  ;;  %s67_s9 = int_to_ptr.vmem [resolvable:$true] %s66_s9 }
  0x36   :  { %s656_s13 = scalar_lea.hbm %s874_s2, 512 }
  0x37   :  { %p657_p10 = scmp.ne.s32.totalorder %s874_s2, %s656_s13  ;;  %p660_p11 = scmp.lt.u32.totalorder %s656_s13, %s874_s2 }
  0x39   :  { %p662_p12 = pnand %p660_p11, %p657_p10 }
  0x3b   :  { %665 = shalt.err (!%p662_p12)
}
  0x3c   :  { %s666_s0 = scalar_lea.vmem %s42_s7, 512  ;;  %p671_p0 = scmp.lt.s32.totalorder %s42_s7, %s42_s7 }
  0x3d   :  { %p667_p13 = scmp.ne.s32.totalorder %s42_s7, %s666_s0  ;;  %p672_p1 = scmp.lt.s32.totalorder %s666_s0, %s666_s0 }
  0x3f   :  { %p673_p2 = por %p672_p1, %p671_p0 }
  0x41   :  { %p674_p3 = pnand %p673_p2, %p667_p13 }
  0x43   :  { %677 = shalt.err (!%p674_p3)
}
  0x44   :  { %47 = dma.hbm_to_vmem [thread:$0]  %s874_s2, 512, %s42_s7, [#allocation6], %s731_s28, %s731_s28, %s732_s29  }
  0x45   :  { %s678_s20 = scalar_lea.hbm %s876_s4, 32 }
  0x46   :  { %p679_p4 = scmp.ne.s32.totalorder %s876_s4, %s678_s20  ;;  %p682_p5 = scmp.lt.u32.totalorder %s678_s20, %s876_s4 }
  0x48   :  { %p684_p6 = pnand %p682_p5, %p679_p4 }
  0x4a   :  { %687 = shalt.err (!%p684_p6)
}
  0x4b   :  { %s688_s25 = scalar_lea.vmem %s67_s9, 32  ;;  %p693_p8 = scmp.lt.s32.totalorder %s67_s9, %s67_s9 }
  0x4c   :  { %p689_p7 = scmp.ne.s32.totalorder %s67_s9, %s688_s25  ;;  %p694_p9 = scmp.lt.s32.totalorder %s688_s25, %s688_s25 }
  0x4e   :  { %p695_p10 = por %p694_p9, %p693_p8 }
  0x50   :  { %p696_p11 = pnand %p695_p10, %p689_p7 }
  0x52   :  { %699 = shalt.err (!%p696_p11)
}
  0x53   :  { %69 = dma.hbm_to_vmem [thread:$0]  %s876_s4, 32, %s67_s9, [#allocation9]  }
  0x54   :  { %722 = dma.done.wait [#allocation3], 128  }
  0x55   :  { %723 = vsyncadd [#allocation3], 4294967168 }
  0x56   :  { %724 = dma.done.wait [#allocation6], 1536  }
  0x57   :  { %725 = vsyncadd [#allocation6], 4294965760 }
  0x58   :  { %726 = dma.done.wait [#allocation9], 544  }
  0x59   :  { %727 = vsyncadd [#allocation9], 4294966752  ;;  %v737_v0 = vmov 0.0|0.0   ;;  %vm738_vm0 = vmmov 0   ;;  %v739_v1 = vmov 0.0   ;;  %v88_v2 = vld [vmem:[#allocation7] sm:$0xff] }
  0x5a   :  { %541 = vmatprep.subr.bf16.mxu0 %v737_v0  ;;  %518 = vmatprep.mubr.msk.f32.mxu0 %vm738_vm0, %v739_v1  ;;  %v89_v3 = vld [vmem:[#allocation7 + $0x8] sm:$0xff]  ;;  %v178_v4 = vld [vmem:[#allocation8] sm:$0xff]  ;;  %v90_v7 = vld [vmem:[#allocation7 + $0x10] sm:$0xff]  ;;  %vm96_vm1 = vcmask 261120   ;;  %vm405_vm2 = vcmask 1041409   ;;  %vm407_vm3 = vcmask 1042434  }
  0x5b   :  { %v542_v5 = vpack.c.bf16 %v89_v3, %v88_v2  ;;  %v179_v6 = vld [vmem:[#allocation8 + $0x8] sm:$0xff]  ;;  %v91_v8 = vld [vmem:[#allocation7 + $0x18] sm:$0xff]  ;;  %v180_v10 = vld [vmem:[#allocation8 + $0x10] sm:$0xff]  ;;  %vm409_vm4 = vcmask 1043459   ;;  %vm411_vm5 = vcmask 1044484   ;;  %vm413_vm6 = vcmask 1045509  }
  0x5c   :  { %v547_v9 = vpack.c.bf16 %v179_v6, %v178_v4  ;;  %v181_v11 = vld [vmem:[#allocation8 + $0x18] sm:$0xff]  ;;  %v545_v12 = vpack.c.bf16 %v91_v8, %v90_v7  ;;  %v172_v14 = vld [vmem:[#allocation5 + $0x10] sm:$0xff]  ;;  %v170_v16 = vld [vmem:[#allocation5] sm:$0xff]  ;;  %v371_v4 = vlaneseq  ;;  %vm415_vm7 = vcmask 1046534   ;;  %s740_s4 = smov [#allocation11]  }
  0x5d   :  { %543 = vmatpush3.bf16.msra.mxu0 %v542_v5  ;;  %v551_v13 = vpack.c.bf16 %v181_v11, %v180_v10  ;;  %532 = vmatprep.mubr.msk.f32.mxu1 %vm96_vm1, %v172_v14  ;;  %v87_v15 = vld [vmem:[#allocation2] sm:$0xff]  ;;  %v174_v18 = vld [vmem:[#allocation5 + $0x20] sm:$0xff]  ;;  %v175_v19 = vld [vmem:[#allocation5 + $0x28] sm:$0xff]  ;;  %vm417_vm8 = vcmask 1047559   ;;  %vm452_vm9 = vcmask 64512   ;;  %s471_s29 = sshll.u32 %s740_s4, 4  ;;  %s472_s29 = int_to_ptr.vmem [resolvable:$true] %s471_s29 }
  0x5e   :  { %555 = vmatprep.subr.bf16.mxu1 %v547_v9  ;;  %544 = vmatprep.subr.bf16.mxu0 %v737_v0  ;;  %v173_v17 = vld [vmem:[#allocation5 + $0x18] sm:$0xff]  ;;  %v176_v20 = vld [vmem:[#allocation5 + $0x30] sm:$0xff]  ;;  %v171_v21 = vld [vmem:[#allocation5 + $0x8] sm:$0xff]  ;;  %v372_v6 = vand.u32 127, %v371_v4  ;;  %v374_v7 = vshrl.u32 %v371_v4, 7  ;;  %s700_s26 = scalar_lea.vmem %s472_s29, 128  ;;  %p705_p13 = scmp.lt.s32.totalorder %s472_s29, %s472_s29 }
  0x5f   :  { %557 = vmatpush3.bf16.msra.mxu1 %v547_v9  ;;  %v177_v22 = vld [vmem:[#allocation5 + $0x38] sm:$0xff]  ;;  %v482_v23 = vld [vmem:[#allocation10] ss:$0 sm:$0xff]  ;;  %v492_v43 = vld [vmem:[#allocation10 + $0x1] ss:$0 sm:$0xff]  ;;  %p701_p12 = scmp.ne.s32.totalorder %s472_s29, %s700_s26  ;;  %p706_p0 = scmp.lt.s32.totalorder %s700_s26, %s700_s26 }
  0x60   :  { %556 = vmatprep.subr.bf16.mxu1 %v551_v13  ;;  %v375_v10 = vsub.s32 %v372_v6, %v374_v7 }
  0x61   :  { %546 = vmatpush3.bf16.msra.mxu0 %v545_v12  ;;  %p707_p1 = por %p706_p0, %p705_p13 }
  0x62   :  { %548 = vmatprep.subr.bf16.mxu0 %v547_v9 }
  0x63   :  { %558 = vmatpush3.bf16.msra.mxu1 %v551_v13  ;;  %p708_p2 = pnand %p707_p1, %p701_p12 }
  0x64   :  { %519 = vmatmul.mubr.msk.f32.vlgmr.msra.gmra.mrb[0].mxu0 %vm96_vm1, %v87_v15 }
  0x65   :  { %550 = vmatpush3.bf16.msra.mxu0 %v547_v9  ;;  %529 = vmatprep.mubr.msk.f32.mxu0 %vm96_vm1, %v170_v16 }
  0x66   :  { %533 = vmatmul.mubr.msk.f32.vlgmr.msra.gmra.mrb[0].mxu1 %vm96_vm1, %v173_v17  ;;  %552 = vmatprep.subr.bf16.mxu0 %v551_v13 }
  0x67   :  { %535 = vmatprep.mubr.msk.f32.mxu1 %vm96_vm1, %v174_v18 }
  0x69   :  { %554 = vmatpush3.bf16.msra.mxu0 %v551_v13 }
  0x6a   :  { %536 = vmatmul.mubr.msk.f32.gmra.mrb[2].mxu1 %vm96_vm1, %v175_v19 }
  0x6b   :  { %538 = vmatprep.mubr.msk.f32.mxu1 %vm96_vm1, %v176_v20 }
  0x6c   :  { %530 = vmatmul.mubr.msk.f32.vlgmr.msra.gmra.mrb[2].mxu0 %vm96_vm1, %v171_v21 }
  0x6e   :  { %539 = vmatmul.mubr.msk.f32.gmra.mrb[4].mxu1 %vm96_vm1, %v177_v22 }
 0x137   :  { %v166_v24 = vpop.f32.mrb[0].mxu0 }
 0x138   :  { %v167_v25 = vadd.f32 %v482_v23, %v166_v24  ;;  %v520_v26 = vpop.f32.mrb[1].mxu0 }
 0x139   :  { %v534_v27 = vpop.f32.mrb[0].mxu1 }
 0x13a   :  { %v314_v28 = vadd.f32 %v534_v27, %v167_v25  ;;  %v282_v29 = vpop.f32.mrb[1].mxu1 }
 0x13b   :  { %v313_v30 = vadd.f32 %v282_v29, %v167_v25 }
 0x13c   :  { %570 = vtanh.f32 %v314_v28 }
 0x13d   :  { %572 = vtanh.f32 %v313_v30  ;;  %v537_v31 = vpop.f32.mrb[2].mxu1 }
 0x13e   :  { %v316_v32 = vadd.f32 %v537_v31, %v167_v25  ;;  %v292_v33 = vpop.f32.mrb[3].mxu1 }
 0x13f   :  { %v315_v34 = vadd.f32 %v292_v33, %v167_v25  ;;  %v531_v35 = vpop.f32.mrb[2].mxu0 }
 0x140   :  { %v312_v36 = vadd.f32 %v531_v35, %v167_v25  ;;  %v272_v37 = vpop.f32.mrb[3].mxu0  ;;  %574 = vtanh.f32 %v316_v32 }
 0x141   :  { %v311_v38 = vadd.f32 %v272_v37, %v167_v25  ;;  %v540_v39 = vpop.f32.mrb[4].mxu1 }
 0x142   :  { %576 = vtanh.f32 %v312_v36  ;;  %v318_v40 = vadd.f32 %v540_v39, %v167_v25  ;;  %v302_v41 = vpop.f32.mrb[5].mxu1 }
 0x143   :  { %578 = vtanh.f32 %v311_v38  ;;  %v317_v42 = vadd.f32 %v302_v41, %v167_v25 }
 0x144   :  { %580 = vtanh.f32 %v318_v40 }
 0x145   :  { %582 = vtanh.f32 %v315_v34 }
 0x146   :  { %v571_v44 = vpop.eup %570  ;;  %584 = vtanh.f32 %v317_v42 }
 0x147   :  { %v573_v45 = vpop.eup %572  ;;  %v334_v48 = vmul.f32 %v571_v44, %v492_v43 }
 0x148   :  { %v333_v46 = vmul.f32 %v573_v45, %v492_v43 }
 0x149   :  { %v348_v53 = vsel %vm96_vm1, %v334_v48, 0.0 }
 0x14a   :  { %v345_v47 = vsel %vm96_vm1, %v333_v46, 0.0  ;;  %v575_v49 = vpop.eup %574 }
 0x14b   :  { %346 = vadd.xlane.f32.xlu1 %v345_v47  ;;  %v336_v54 = vmul.f32 %v575_v49, %v492_v43 }
 0x14c   :  { %v577_v50 = vpop.eup %576 }
 0x14d   :  { %v579_v51 = vpop.eup %578  ;;  %v332_v52 = vmul.f32 %v577_v50, %v492_v43  ;;  %v354_v59 = vsel %vm96_vm1, %v336_v54, 0.0 }
 0x14e   :  { %v581_v55 = vpop.eup %580  ;;  %v331_v57 = vmul.f32 %v579_v51, %v492_v43 }
 0x14f   :  { %349 = vadd.xlane.f32.xlu1 %v348_v53  ;;  %v342_v56 = vsel %vm96_vm1, %v332_v52, 0.0  ;;  %v583_v58 = vpop.eup %582  ;;  %v338_v60 = vmul.f32 %v581_v55, %v492_v43 }
 0x150   :  { %343 = vadd.xlane.f32.xlu0 %v342_v56  ;;  %v339_v61 = vsel %vm96_vm1, %v331_v57, 0.0  ;;  %v335_v62 = vmul.f32 %v583_v58, %v492_v43  ;;  %v585_v63 = vpop.eup %584 }
 0x151   :  { %v360_v0 = vsel %vm96_vm1, %v338_v60, 0.0  ;;  %v337_v2 = vmul.f32 %v585_v63, %v492_v43 }
 0x152   :  { %v351_v1 = vsel %vm96_vm1, %v335_v62, 0.0 }
 0x153   :  { %355 = vadd.xlane.f32.xlu1 %v354_v59  ;;  %v357_v3 = vsel %vm96_vm1, %v337_v2, 0.0 }
 0x154   :  { %340 = vadd.xlane.f32.xlu0 %v339_v61 }
 0x157   :  { %361 = vadd.xlane.f32.xlu1 %v360_v0 }
 0x158   :  { %352 = vadd.xlane.f32.xlu0 %v351_v1 }
 0x15c   :  { %358 = vadd.xlane.f32.xlu0 %v357_v3 }
 0x1d8   :  { %v347_v5 = vpop.xlane.xlu1 %346 }
 0x1d9   :  { %v384_v15 = vrot.slane %v347_v5, %v375_v10 }
 0x1dc   :  { %v350_v8 = vpop.xlane.xlu1 %349 }
 0x1dd   :  { %v344_v9 = vpop.xlane.xlu0 %343  ;;  %v388_v16 = vrot.slane %v350_v8, %v375_v10 }
 0x1de   :  { %v380_v12 = vrot.slane %v344_v9, %v375_v10 }
 0x1e0   :  { %v356_v13 = vpop.xlane.xlu1 %355 }
 0x1e1   :  { %v341_v11 = vpop.xlane.xlu0 %340  ;;  %v396_v24 = vrot.slane %v356_v13, %v375_v10 }
 0x1e2   :  { %v376_v14 = vrot.slane %v341_v11, %v375_v10 }
 0x1e4   :  { %v406_v17 = vsel %vm405_vm2, %v380_v12, %v376_v14  ;;  %v362_v22 = vpop.xlane.xlu1 %361 }
 0x1e5   :  { %v408_v18 = vsel %vm407_vm3, %v384_v15, %v406_v17  ;;  %v353_v19 = vpop.xlane.xlu0 %352  ;;  %v404_v27 = vrot.slane %v362_v22, %v375_v10 }
 0x1e6   :  { %v410_v20 = vsel %vm409_vm4, %v388_v16, %v408_v18  ;;  %v392_v21 = vrot.slane %v353_v19, %v375_v10 }
 0x1e8   :  { %v412_v23 = vsel %vm411_vm5, %v392_v21, %v410_v20 }
 0x1e9   :  { %v359_v25 = vpop.xlane.xlu0 %358  ;;  %v414_v28 = vsel %vm413_vm6, %v396_v24, %v412_v23 }
 0x1ea   :  { %v400_v26 = vrot.slane %v359_v25, %v375_v10 }
 0x1ec   :  { %v416_v29 = vsel %vm415_vm7, %v400_v26, %v414_v28 }
 0x1ed   :  { %v418_v30 = vsel %vm417_vm8, %v404_v27, %v416_v29 }
 0x1ee   :  { %420 = vxpose.xlu0.b32.start.end [1/1] (short) (narrow) %v418_v30, 8 }
 0x26e   :  { %v436_v31 = vpop.trf.xlu0 }
 0x26f   :  { %v453_v32 = vsel %vm452_vm9, %v436_v31, -inf }
 0x270   :  { %454 = vmax.xlane.f32.xlu1 %v453_v32 }
 0x2fd   :  { %v455_v33 = vpop.xlane.xlu1 %454 }
 0x2fe   :  { %v456_v34 = vsub.f32 %v436_v31, %v455_v33 }
 0x300   :  { %v457_v35 = vmul.f32 1.442695, %v456_v34 }
 0x302   :  { %586 = vpow2.f32 %v457_v35 }
 0x30c   :  { %v587_v36 = vpop.eup %586 }
 0x30d   :  { %v459_v37 = vsel %vm452_vm9, %v587_v36, 0.0 }
 0x30e   :  { %460 = vadd.xlane.f32.xlu1 %v459_v37 }
 0x39b   :  { %v461_v38 = vpop.xlane.xlu1 %460 }
 0x39c   :  { %588 = vrcp.f32 %v461_v38 }
 0x3a6   :  { %v589_v39 = vpop.eup %588 }
 0x3a7   :  { %v463_v40 = vmul.f32 %v589_v39, %v587_v36 }
 0x3a9   :  { %464 = vst.msk [vmem:[#allocation11] sm:$0xff] %vm452_vm9, %v463_v40 }
 0x3aa   :  { %711 = shalt.err (!%p708_p2)
}
 0x3ab   :  { %s712_s30 = scalar_lea.hbm %s877_s5, 128 }
 0x3ac   :  { %p713_p3 = scmp.ne.s32.totalorder %s877_s5, %s712_s30  ;;  %p716_p4 = scmp.lt.u32.totalorder %s712_s30, %s877_s5 }
 0x3ae   :  { %p718_p5 = pnand %p716_p4, %p713_p3 }
 0x3b0   :  { %721 = shalt.err (!%p718_p5)
}
 0x3b1   :  { %474 = dma.vmem_to_hbm [thread:$0]  %s472_s29, 128, %s877_s5, [#allocation4]  }
 0x3b2   :  { %728 = dma.done.wait [#allocation4], 128  }
 0x3b3   :  { %729 = vsyncadd [#allocation4], 4294967168 }
 0x3b4   :  { %478 = vsyncpa [#allocation3], 1 }
 0x3b5   :  { %479 = vsyncpa [#allocation6], 1 }
 0x3b6   :  { %480 = vsyncpa [#allocation9], 1 }
 0x3b7   :  { %481 = vsyncpa [#allocation4], 1 }

</bundles_post_ra>
